<compile_context>
chip_gen: v5e
topology: v5e:2x2
jax: 0.10.0
libtpu: 0.0.40
codegen_flags: <defaults>
</compile_context>

<pallas_src>
from functools import partial

import jax
import jax.numpy as jnp
from jax.experimental import pallas as pl
from jax.experimental.pallas import tpu as pltpu

_LANES = 128


def _cdiv(a: int, b: int) -> int:
    return (a + b - 1) // b


def _round_up(a: int, b: int) -> int:
    return _cdiv(a, b) * b


def _pad_offsets_kernel(last_ref, in_ref, out_ref, *, n, block_rows):
    """Produce one (block_rows, 128) tile of the padded offsets array.

    last_ref : SMEM scalar-prefetch ref, shape (1,), holds offsets[-1].
    in_ref   : (block_rows, 128) tile of the (zero-padded) input offsets.
    out_ref  : (block_rows, 128) tile of the output.
    """
    block_elems = block_rows * _LANES
    g = pl.program_id(0)
    bnd_blk = n // block_elems  # static: index of the tile containing flat index n

    # Tile wholly inside the prefix [0, n): pure copy, no mask work.
    @pl.when(g < bnd_blk)
    def _copy():
        out_ref[...] = in_ref[...]

    # Boundary tile: copy the remaining prefix, fill the rest with offsets[-1].
    # (Also covers n % block_elems == 0, where the mask is all-False.)
    @pl.when(g == bnd_blk)
    def _mixed():
        n_local = n - bnd_blk * block_elems  # static, in [0, block_elems)
        r = jax.lax.broadcasted_iota(jnp.int32, (block_rows, _LANES), 0)
        c = jax.lax.broadcasted_iota(jnp.int32, (block_rows, _LANES), 1)
        flat_local = r * _LANES + c
        out_ref[...] = jnp.where(flat_local < n_local, in_ref[...], last_ref[0])

    # Tile wholly inside the padded tail [n, size): pure broadcast fill.
    @pl.when(g > bnd_blk)
    def _fill():
        out_ref[...] = jnp.full((block_rows, _LANES), last_ref[0], out_ref.dtype)


def pad_offsets_pallas(offsets: jax.Array, size: int, *,
                       max_block_rows: int = 2048,
                       min_pallas_size: int = 4096) -> jax.Array:
    """JAX/Pallas equivalent of CuGraphBaseConv.pad_offsets."""
    assert offsets.ndim == 1
    n = int(offsets.shape[0])
    assert n >= 1, "CSC offsets (indptr) must have at least one element"
    assert size >= n, "size must be >= len(offsets)"
    dtype = offsets.dtype

    # Tiny inputs (or non-int32 dtypes) go through plain XLA: the fixed Pallas
    # launch cost dwarfs a few-KB fill, and TPU vector ops want 32-bit data.
    # TODO(synk): int64 offsets (graphs with >2^31 edges) are handled only by
    # the XLA fallback; validate/convert explicitly on the caller side.
    if size < min_pallas_size or dtype != jnp.int32:
        tail = jnp.full((size - n,), offsets[-1], dtype=dtype)
        return jnp.concatenate([offsets, tail])

    # ---- tiling choices (all static) ------------------------------------
    rows_out = _cdiv(size, _LANES)
    block_rows = int(min(max_block_rows, _round_up(rows_out, 8)))
    block_elems = block_rows * _LANES

    num_blocks = _cdiv(rows_out, block_rows)          # grid extent
    rows_out_p = num_blocks * block_rows              # all output tiles full
    size_p = rows_out_p * _LANES

    n_p = _round_up(n, block_elems)                   # input padded to full tiles
    n_blocks_in = n_p // block_elems

    # O(n) input prep: pad to a whole number of tiles and view as (rows, 128).
    in2d = jnp.pad(offsets, (0, n_p - n)).reshape(n_p // _LANES, _LANES)
    last = offsets[-1:]                               # shape (1,), -> SMEM prefetch

    out2d = pl.pallas_call(
        partial(_pad_offsets_kernel, n=n, block_rows=block_rows),
        out_shape=jax.ShapeDtypeStruct((rows_out_p, _LANES), dtype),
        grid_spec=pltpu.PrefetchScalarGridSpec(
            num_scalar_prefetch=1,
            grid=(num_blocks,),
            in_specs=[
                # Tail tiles clamp to the last input tile; since the block index
                # does not change across those steps the input DMA is elided.
                pl.BlockSpec(
                    (block_rows, _LANES),
                    lambda g, last_ref: (jnp.minimum(g, n_blocks_in - 1), 0),
                ),
            ],
            out_specs=pl.BlockSpec(
                (block_rows, _LANES), lambda g, last_ref: (g, 0)),
        ),
        compiler_params=pltpu.CompilerParams(
            dimension_semantics=("parallel",)),
    )(last, in2d)

    flat = out2d.reshape(-1)
    # Final prefix slice only when size is not tile-aligned (one O(size) XLA
    # slice; fuses into the consumer in real pipelines).
    return flat if size_p == size else flat[:size]


class CuGraphBaseConv:
    """JAX port of the abstract cugraph-ops base conv module."""

    def __init__(self):
        # TODO(synk): the PyTorch version caches/resizes `_cached_offsets_fg`
        # in place; functional JAX has no in-place buffer resize, so the padded
        # array is produced fresh on each call.
        self._cached_offsets_fg = None

    def reset_parameters(self):
        """Abstract in the reference module — no parameters exist here."""
        raise NotImplementedError

    def forward(self, *args):
        """Abstract in the reference module."""
        raise NotImplementedError

    def pad_offsets(self, offsets: jax.Array, size: int) -> jax.Array:
        return pad_offsets_pallas(offsets, size)


if __name__ == "__main__":
    key = jax.random.PRNGKey(0)
    module = CuGraphBaseConv()

    def make_offsets(k, num_dst):
        deg = jax.random.randint(k, (num_dst,), 0, 5, dtype=jnp.int32)
        return jnp.concatenate(
            [jnp.zeros((1,), jnp.int32), jnp.cumsum(deg, dtype=jnp.int32)])

    def reference(offsets, size):
        n = offsets.shape[0]
        return jnp.concatenate(
            [offsets, jnp.full((size - n,), offsets[-1], dtype=offsets.dtype)])

    k1, k2, k3 = jax.random.split(key, 3)

    # 1) Tiny input -> XLA fast path (below the Pallas size threshold).
    off1 = make_offsets(k1, 8)                          # n = 9
    out1 = jax.block_until_ready(module.pad_offsets(off1, 17))
    assert out1.shape == (17,) and out1.dtype == off1.dtype
    assert bool(jnp.array_equal(out1, reference(off1, 17)))

    # 2) Pallas path, default tiling (single full tile).
    off2 = make_offsets(k2, 300)                        # n = 301
    out2 = jax.block_until_ready(module.pad_offsets(off2, 9000))
    assert out2.shape == (9000,) and out2.dtype == off2.dtype
    assert bool(jnp.array_equal(out2, reference(off2, 9000)))

    # 3) Pallas path, small tiles to exercise copy / boundary / fill branches
    #    of the gridded kernel at small shapes.
    off3 = make_offsets(k3, 2500)                       # n = 2501
    out3 = jax.block_until_ready(
        pad_offsets_pallas(off3, 7000, max_block_rows=8, min_pallas_size=0))
    assert out3.shape == (7000,) and out3.dtype == off3.dtype
    assert bool(jnp.array_equal(out3, reference(off3, 7000)))

    print("KERNEL_OK")
</pallas_src>

<mosaic_0001>
module attributes {stable_mosaic.version = 11 : i64} {
  func.func @_pad_offsets_kernel(%arg0: i32, %arg1: memref<1xi32, #tpu.memory_space<smem>>, %arg2: memref<72x128xi32, #tpu.memory_space<vmem>>, %arg3: memref<72x128xi32, #tpu.memory_space<vmem>>) attributes {dimension_semantics = [#tpu.dimension_semantics<parallel>], iteration_bounds = array<i64: 1>, scalar_prefetch = 1 : i64, scratch_operands = 0 : i64, tpu.core_type = #tpu.core_type<tc>, window_params = [{transform_indices = @transform_0, window_bounds = array<i64: 72, 128>}, {transform_indices = @transform_1, window_bounds = array<i64: 72, 128>}]} {
    %c0_i32 = arith.constant 0 : i32
    %0 = arith.cmpi slt, %arg0, %c0_i32 : i32
    %1 = arith.extui %0 : i1 to i32
    %c0_i32_0 = arith.constant 0 : i32
    %2 = arith.cmpi ne, %1, %c0_i32_0 : i32
    scf.if %2 {
      %c0 = arith.constant 0 : index
      %c0_5 = arith.constant 0 : index
      %9 = vector.load %arg2[%c0, %c0_5] : memref<72x128xi32, #tpu.memory_space<vmem>>, vector<72x128xi32>
      %c0_6 = arith.constant 0 : index
      %c0_7 = arith.constant 0 : index
      %10 = vector.load %arg3[%c0_6, %c0_7] : memref<72x128xi32, #tpu.memory_space<vmem>>, vector<72x128xi32>
      tpu.vector_store %arg3[%c0_6, %c0_7], %9 {strides = array<i32>} : memref<72x128xi32, #tpu.memory_space<vmem>>, vector<72x128xi32>,
    } else {
    }
    %c0_i32_1 = arith.constant 0 : i32
    %3 = arith.cmpi eq, %arg0, %c0_i32_1 : i32
    %4 = arith.extui %3 : i1 to i32
    %c0_i32_2 = arith.constant 0 : i32
    %5 = arith.cmpi ne, %4, %c0_i32_2 : i32
    scf.if %5 {
      %9 = tpu.iota {dimensions = array<i32: 0>} : vector<72x128xi32>
      %10 = tpu.iota {dimensions = array<i32: 1>} : vector<72x128xi32>
      %c128_i32 = arith.constant 128 : i32
      %11 = vector.broadcast %c128_i32 : i32 to vector<72x128xi32>
      %12 = arith.muli %9, %11 : vector<72x128xi32>
      %13 = arith.addi %12, %10 : vector<72x128xi32>
      %c301_i32 = arith.constant 301 : i32
      %14 = vector.broadcast %c301_i32 : i32 to vector<72x128xi32>
      %15 = arith.cmpi slt, %13, %14 : vector<72x128xi32>
      %c0 = arith.constant 0 : index
      %c0_5 = arith.constant 0 : index
      %16 = vector.load %arg2[%c0, %c0_5] : memref<72x128xi32, #tpu.memory_space<vmem>>, vector<72x128xi32>
      %c0_6 = arith.constant 0 : index
      %17 = memref.load %arg1[%c0_6] : memref<1xi32, #tpu.memory_space<smem>>
      %18 = vector.broadcast %17 : i32 to vector<72x128xi32>
      %19 = arith.select %15, %16, %18 : vector<72x128xi1>, vector<72x128xi32>
      %c0_7 = arith.constant 0 : index
      %c0_8 = arith.constant 0 : index
      %20 = vector.load %arg3[%c0_7, %c0_8] : memref<72x128xi32, #tpu.memory_space<vmem>>, vector<72x128xi32>
      tpu.vector_store %arg3[%c0_7, %c0_8], %19 {strides = array<i32>} : memref<72x128xi32, #tpu.memory_space<vmem>>, vector<72x128xi32>,
    } else {
    }
    %c0_i32_3 = arith.constant 0 : i32
    %6 = arith.cmpi sgt, %arg0, %c0_i32_3 : i32
    %7 = arith.extui %6 : i1 to i32
    %c0_i32_4 = arith.constant 0 : i32
    %8 = arith.cmpi ne, %7, %c0_i32_4 : i32
    scf.if %8 {
      %c0 = arith.constant 0 : index
      %9 = memref.load %arg1[%c0] : memref<1xi32, #tpu.memory_space<smem>>
      %10 = vector.broadcast %9 : i32 to vector<72x128xi32>
      %c0_5 = arith.constant 0 : index
      %c0_6 = arith.constant 0 : index
      %11 = vector.load %arg3[%c0_5, %c0_6] : memref<72x128xi32, #tpu.memory_space<vmem>>, vector<72x128xi32>
      tpu.vector_store %arg3[%c0_5, %c0_6], %10 {strides = array<i32>} : memref<72x128xi32, #tpu.memory_space<vmem>>, vector<72x128xi32>,
    } else {
    }
    return
  }
  func.func @transform_0(%arg0: i32, %arg1: memref<1xi32, #tpu.memory_space<smem>>) -> (i32, i32) {
    %c0_i32 = arith.constant 0 : i32
    %0 = arith.minsi %arg0, %c0_i32 : i32
    %c0_i32_0 = arith.constant 0 : i32
    %c0_i32_1 = arith.constant 0 : i32
    return %0, %c0_i32_0 : i32, i32
  }
  func.func @transform_1(%arg0: i32, %arg1: memref<1xi32, #tpu.memory_space<smem>>) -> (i32, i32) {
    %c0_i32 = arith.constant 0 : i32
    %c0_i32_0 = arith.constant 0 : i32
    return %arg0, %c0_i32 : i32, i32
  }
}

</mosaic_0001>

<bundles_post_ra>
// kernel: tpu_custom_call.1
= control target key start
LH: loop header
LB: loop body
LE: loop exit
PB: predicated region body
PF: predicated region fallthrough
CT: control target
= control target key end

     0   :  { %8 = vsyncpa [#allocation5], 0  ;;  %s256_s0 = inlined_call_operand.<no memory space> [shape: s32[1], index: 0, kind: input, shape index: {}]   ;;  %s257_s1 = inlined_call_operand.hbm [shape: s32[72,128], index: 1, kind: input, shape index: {}]   ;;  %s258_s2 = inlined_call_operand.hbm [shape: s32[72,128], index: 2, kind: output, shape index: {}]  }
   0x1   :  { %9 = vsyncpa [#allocation6], 0  ;;  %s14_s11 = sshll.u32 %s257_s1, 4  ;;  %s211_s12 = smov [#allocation4]   ;;  %s15_s11 = int_to_ptr.hbm [resolvable:$true] %s14_s11 }
   0x2   :  { %s16_s13 = sshll.u32 %s211_s12, 4  ;;  %s212_s14 = smov 128   ;;  %s17_s13 = int_to_ptr.vmem [resolvable:$true] %s16_s13 }
   0x3   :  { %s213_s15 = smov 8  }
   0x4   :  { %22 = dma.hbm_to_vmem [thread:$0]  %s15_s11, 1152, %s17_s13, [#allocation5], %s212_s14, %s212_s14, %s213_s15  }
   0x5   :  { %207 = dma.done.wait [#allocation5], 1152  }
   0x6   :  { %208 = vsyncadd [#allocation5], 4294966144  ;;  %v53_v0 = vlaneseq  ;;  %v239_v3 = vstv %s256_s0  ;;  %v92_v16 = vld [vmem:[#allocation4] sm:$0xff]  ;;  %v93_v21 = vld [vmem:[#allocation4 + $0x8] sm:$0xff]  ;;  %s214_s0 = smov [#allocation7]   ;;  %s142_s20 = sshll.u32 %s258_s2, 4  ;;  %s143_s20 = int_to_ptr.hbm [resolvable:$true] %s142_s20 }
   0x7   :  { %v94_v23 = vld [vmem:[#allocation4 + $0x10] sm:$0xff]  ;;  %v95_v25 = vld [vmem:[#allocation4 + $0x18] sm:$0xff]  ;;  %v96_v28 = vld [vmem:[#allocation4 + $0x20] sm:$0xff]  ;;  %s140_s1 = sshll.u32 %s214_s0, 4  ;;  %s141_s1 = int_to_ptr.vmem [resolvable:$true] %s140_s1 }
   0x8   :  { %v54_v1 = vshrl.u32 %v53_v0, 7  ;;  %v64_v2 = vand.u32 127, %v53_v0  ;;  %v97_v31 = vld [vmem:[#allocation4 + $0x28] sm:$0xff]  ;;  %v98_v36 = vld [vmem:[#allocation4 + $0x30] sm:$0xff]  ;;  %v99_v39 = vld [vmem:[#allocation4 + $0x38] sm:$0xff] }
   0x9   :  { %v100_v46 = vld [vmem:[#allocation4 + $0x40] sm:$0xff] }
   0xa   :  { %v65_v4 = vmul.u32 128, %v54_v1  ;;  %v55_v5 = vadd.s32 8, %v54_v1  ;;  %v56_v6 = vadd.s32 16, %v54_v1  ;;  %v57_v7 = vadd.s32 24, %v54_v1 }
   0xb   :  { %v58_v8 = vadd.s32 32, %v54_v1  ;;  %v59_v9 = vadd.s32 40, %v54_v1  ;;  %v60_v10 = vadd.s32 48, %v54_v1  ;;  %v61_v11 = vadd.s32 56, %v54_v1 }
   0xc   :  { %v74_v12 = vadd.s32 %v65_v4, %v64_v2  ;;  %v66_v13 = vmul.u32 128, %v55_v5  ;;  %v67_v14 = vmul.u32 128, %v56_v6  ;;  %v68_v15 = vmul.u32 128, %v57_v7 }
   0xd   :  { %v69_v17 = vmul.u32 128, %v58_v8  ;;  %v70_v18 = vmul.u32 128, %v59_v9  ;;  %v71_v19 = vmul.u32 128, %v60_v10  ;;  %v72_v32 = vmul.u32 128, %v61_v11 }
   0xe   :  { %vm83_vm0 = vcmp.lt.s32.totalorder %v74_v12, 301  ;;  %v75_v20 = vadd.s32 %v66_v13, %v64_v2  ;;  %v76_v22 = vadd.s32 %v67_v14, %v64_v2  ;;  %v77_v24 = vadd.s32 %v68_v15, %v64_v2 }
   0xf   :  { %v103_v26 = vsel %vm83_vm0, %v92_v16, %v239_v3  ;;  %v78_v27 = vadd.s32 %v69_v17, %v64_v2  ;;  %v79_v29 = vadd.s32 %v70_v18, %v64_v2  ;;  %v80_v30 = vadd.s32 %v71_v19, %v64_v2 }
  0x10   :  { %112 = vst [vmem:[#allocation7] sm:$0xff] %v103_v26  ;;  %vm84_vm1 = vcmp.lt.s32.totalorder %v75_v20, 301  ;;  %vm85_vm2 = vcmp.lt.s32.totalorder %v76_v22, 301  ;;  %vm86_vm3 = vcmp.lt.s32.totalorder %v77_v24, 301  ;;  %v81_v38 = vadd.s32 %v72_v32, %v64_v2 }
  0x11   :  { %v104_v33 = vsel %vm84_vm1, %v93_v21, %v239_v3  ;;  %v105_v34 = vsel %vm85_vm2, %v94_v23, %v239_v3  ;;  %v106_v35 = vsel %vm86_vm3, %v95_v25, %v239_v3  ;;  %vm87_vm4 = vcmp.lt.s32.totalorder %v78_v27, 301 }
  0x12   :  { %113 = vst [vmem:[#allocation7 + $0x8] sm:$0xff] %v104_v33  ;;  %v107_v37 = vsel %vm87_vm4, %v96_v28, %v239_v3  ;;  %vm88_vm5 = vcmp.lt.s32.totalorder %v79_v29, 301  ;;  %vm89_vm6 = vcmp.lt.s32.totalorder %v80_v30, 301  ;;  %v62_v41 = vadd.s32 64, %v54_v1 }
  0x13   :  { %114 = vst [vmem:[#allocation7 + $0x10] sm:$0xff] %v105_v34  ;;  %v108_v40 = vsel %vm88_vm5, %v97_v31, %v239_v3  ;;  %v109_v42 = vsel %vm89_vm6, %v98_v36, %v239_v3  ;;  %vm90_vm7 = vcmp.lt.s32.totalorder %v81_v38, 301 }
  0x14   :  { %115 = vst [vmem:[#allocation7 + $0x18] sm:$0xff] %v106_v35  ;;  %v110_v43 = vsel %vm90_vm7, %v99_v39, %v239_v3  ;;  %v73_v44 = vmul.u32 128, %v62_v41 }
  0x15   :  { %116 = vst [vmem:[#allocation7 + $0x20] sm:$0xff] %v107_v37 }
  0x16   :  { %117 = vst [vmem:[#allocation7 + $0x28] sm:$0xff] %v108_v40  ;;  %v82_v45 = vadd.s32 %v73_v44, %v64_v2 }
  0x17   :  { %118 = vst [vmem:[#allocation7 + $0x30] sm:$0xff] %v109_v42 }
  0x18   :  { %119 = vst [vmem:[#allocation7 + $0x38] sm:$0xff] %v110_v43  ;;  %vm91_vm8 = vcmp.lt.s32.totalorder %v82_v45, 301 }
  0x19   :  { %v111_v47 = vsel %vm91_vm8, %v100_v46, %v239_v3 }
  0x1a   :  { %120 = vst [vmem:[#allocation7 + $0x40] sm:$0xff] %v111_v47 }
  0x1b   :  { %148 = dma.vmem_to_hbm [thread:$0]  %s141_s1, 1152, %s143_s20, [#allocation6], %s212_s14, %s212_s14, %s213_s15  }
  0x1c   :  { %209 = dma.done.wait [#allocation6], 1152  }
  0x1d   :  { %210 = vsyncadd [#allocation6], 4294966144 }
  0x1e   :  { %153 = vsyncpa [#allocation5], 1 }
  0x1f   :  { %154 = vsyncpa [#allocation6], 1 }

</bundles_post_ra>
